<compile_context>
chip_gen: v7x
topology: tpu7x:2x2x1
jax: 0.10.0
libtpu: 0.0.40
codegen_flags: <defaults>
</compile_context>

<pallas_src>
import functools

import jax
import jax.numpy as jnp
from jax.experimental import pallas as pl
from jax.experimental.pallas import tpu as pltpu


def _round_up(x, m):
    return (x + m - 1) // m * m


def mixing_kernel(state_ref, qs_ref, wfused_ref, v2w_ref, v2b_ref, out_ref,
                  *, hidden_dim, num_agent):
    H = hidden_dim
    HN = H * num_agent

    s = state_ref[...]                                   # (TM, S+1), bias column folded in
    q = qs_ref[...].astype(jnp.float32)                  # (TM, N)

    # One fused MXU matmul for all four hypernetwork heads (+ their biases).
    z = jnp.dot(s, wfused_ref[...],
                preferred_element_type=jnp.float32)      # (TM, H*N + 3H)

    w1 = jnp.abs(z[:, :HN])                              # (TM, H*N), agent-major: col = a*H + h
    b1 = z[:, HN:HN + H]                                 # (TM, H)
    w2 = jnp.abs(z[:, HN + H:HN + 2 * H])                # (TM, H)
    vh = jnp.maximum(z[:, HN + 2 * H:HN + 3 * H], 0.0)   # (TM, H)  ReLU of V[0]

    # per-row bmm(w1, qs): unrolled VPU FMA over agents (no 3-D reshape/relayout).
    hz = b1
    for a in range(num_agent):
        hz = hz + q[:, a:a + 1] * w1[:, a * H:(a + 1) * H]

    # ELU (alpha = 1)
    h = jnp.where(hz > 0.0, hz, jnp.exp(jnp.minimum(hz, 0.0)) - 1.0)

    # q_tot_r = sum_h w2*h + sum_h vh*v2w + v2b.
    # Do both hidden reductions in one go and land the result lane-major (1, TM)
    # via a trans-B contraction so the output store is a full, unmasked vst.
    m = w2 * h + vh * v2w_ref[...]                       # (TM, H)
    ones = jnp.ones((1, H), jnp.float32)
    row = jax.lax.dot_general(ones, m,
                              dimension_numbers=(((1,), (1,)), ((), ())),
                              preferred_element_type=jnp.float32)   # (1, TM)

    out_ref[...] = row + v2b_ref[0]                      # scalar V bias from SMEM


def init_params(key, num_agent, state_dim, hidden_dim):
    """Deterministic synthetic parameters. Linear weights stored as (in, out)."""
    ks = jax.random.split(key, 10)

    def lin(kw, kb, din, dout):
        scale = 1.0 / jnp.sqrt(din)
        w = jax.random.uniform(kw, (din, dout), jnp.float32, -scale, scale)
        b = jax.random.uniform(kb, (1, dout), jnp.float32, -scale, scale)
        return w, b

    p = {}
    p["w1_w"], p["w1_b"] = lin(ks[0], ks[1], state_dim, hidden_dim * num_agent)
    p["b1_w"], p["b1_b"] = lin(ks[2], ks[3], state_dim, hidden_dim)
    p["w2_w"], p["w2_b"] = lin(ks[4], ks[5], state_dim, hidden_dim)
    p["v1_w"], p["v1_b"] = lin(ks[6], ks[7], state_dim, hidden_dim)
    p["v2_w"], p["v2_b"] = lin(ks[8], ks[9], hidden_dim, 1)
    return p


def mixing_net_forward(qs, state, params, *, hidden_dim, tile_rows=512,
                       matmul_dtype=jnp.float32):
    """qs: (B, T, N) f32, state: (B, T, S) f32 -> (B, T) f32.

    matmul_dtype=jnp.bfloat16 halves HBM input traffic (useful on v5e); accumulation
    and all post-matmul elementwise math stay in f32.
    """
    B, T, N = qs.shape
    S = state.shape[-1]
    H = hidden_dim
    BT = B * T

    # ---- weight prep (done once per call, outside the kernel) ----------------
    # agent-major re-ordering of hypernetwork_w1 columns: new column index = a*H + h
    w1_w_am = params["w1_w"].reshape(S, H, N).transpose(0, 2, 1).reshape(S, H * N)
    w1_b_am = params["w1_b"].reshape(1, H, N).transpose(0, 2, 1).reshape(1, H * N)
    w_cat = jnp.concatenate(
        [w1_w_am, params["b1_w"], params["w2_w"], params["v1_w"]], axis=1)
    b_cat = jnp.concatenate(
        [w1_b_am, params["b1_b"], params["w2_b"], params["v1_b"]], axis=1)
    w_fused = jnp.concatenate([w_cat, b_cat], axis=0).astype(matmul_dtype)  # (S+1, HN+3H)
    v2_row = params["v2_w"].reshape(1, H).astype(jnp.float32)               # (1, H)
    v2_b = params["v2_b"].reshape(1).astype(jnp.float32)                    # (1,)  scalar

    # ---- flatten, append bias column, pad rows to a multiple of the tile -----
    qs2 = qs.reshape(BT, N).astype(jnp.float32)
    st2 = state.reshape(BT, S).astype(matmul_dtype)
    st2 = jnp.concatenate([st2, jnp.ones((BT, 1), matmul_dtype)], axis=1)   # (BT, S+1)

    tile_rows = max(128, _round_up(min(tile_rows, BT), 128))   # lane-dense output tiles
    bt_pad = _round_up(BT, tile_rows)
    if bt_pad != BT:
        qs2 = jnp.pad(qs2, ((0, bt_pad - BT), (0, 0)))
        st2 = jnp.pad(st2, ((0, bt_pad - BT), (0, 0)))
    num_tiles = bt_pad // tile_rows

    kernel = functools.partial(mixing_kernel, hidden_dim=H, num_agent=N)
    full = lambda a: pl.BlockSpec(a.shape, lambda i: (0, 0))   # resident weight block

    out = pl.pallas_call(
        kernel,
        out_shape=jax.ShapeDtypeStruct((1, bt_pad), jnp.float32),
        grid_spec=pltpu.PrefetchScalarGridSpec(
            num_scalar_prefetch=0,
            grid=(num_tiles,),
            in_specs=[
                pl.BlockSpec((tile_rows, S + 1), lambda i: (i, 0)),   # state (+bias col)
                pl.BlockSpec((tile_rows, N), lambda i: (i, 0)),       # qs tile
                full(w_fused),                                        # fused hyper weights
                full(v2_row),                                         # V[2] weight row
                pl.BlockSpec(memory_space=pltpu.MemorySpace.SMEM),    # V[2] bias scalar
            ],
            out_specs=pl.BlockSpec((1, tile_rows), lambda i: (0, i)),  # lane-dense row
        ),
        compiler_params=pltpu.CompilerParams(
            dimension_semantics=("parallel",)),
    )(st2, qs2, w_fused, v2_row, v2_b)

    return out[0, :BT].reshape(B, T)


def mixing_net_reference(qs, state, params, *, hidden_dim):
    """Plain-JAX reference mirroring the PyTorch forward (unpermuted weights)."""
    B, T, N = qs.shape
    BT = B * T
    st = state.reshape(BT, -1)
    q = qs.reshape(BT, N)
    w1 = jnp.abs(st @ params["w1_w"] + params["w1_b"]).reshape(BT, hidden_dim, N)
    b1 = (st @ params["b1_w"] + params["b1_b"]).reshape(BT, hidden_dim, 1)
    w2 = jnp.abs(st @ params["w2_w"] + params["w2_b"]).reshape(BT, 1, hidden_dim)
    vh = jnp.maximum(st @ params["v1_w"] + params["v1_b"], 0.0)
    v = (vh @ params["v2_w"] + params["v2_b"]).reshape(BT, 1, 1)
    hz = jnp.matmul(w1, q[:, :, None]) + b1
    h = jnp.where(hz > 0.0, hz, jnp.exp(jnp.minimum(hz, 0.0)) - 1.0)
    out = jnp.matmul(w2, h) + v
    return out.reshape(B, T)


# TODO(synk): MixingNet.update() (target-network parameter copy) is a training utility,
# not part of the forward pass, so it is not implemented as a kernel.

if __name__ == "__main__":
    # small shapes consistent with the module
    B, T = 2, 8
    num_agent, state_dim, hidden_dim = 4, 16, 32

    key = jax.random.PRNGKey(0)
    k_q, k_s, k_p = jax.random.split(key, 3)
    qs = jax.random.normal(k_q, (B, T, num_agent), jnp.float32)
    state = jax.random.normal(k_s, (B, T, state_dim), jnp.float32)
    params = init_params(k_p, num_agent, state_dim, hidden_dim)

    out = mixing_net_forward(qs, state, params, hidden_dim=hidden_dim)
    out = jax.block_until_ready(out)

    ref = mixing_net_reference(qs, state, params, hidden_dim=hidden_dim)
    assert out.shape == (B, T)
    assert jnp.allclose(out, ref, atol=1e-4, rtol=1e-4), (out, ref)

    print("KERNEL_OK")
</pallas_src>

<mosaic_0001>
module attributes {stable_mosaic.version = 11 : i64} {
  func.func @mixing_kernel(%arg0: i32, %arg1: memref<128x17xf32, #tpu.memory_space<vmem>>, %arg2: memref<128x4xf32, #tpu.memory_space<vmem>>, %arg3: memref<17x224xf32, #tpu.memory_space<vmem>>, %arg4: memref<1x32xf32, #tpu.memory_space<vmem>>, %arg5: memref<1xf32, #tpu.memory_space<smem>>, %arg6: memref<1x128xf32, #tpu.memory_space<vmem>>) attributes {dimension_semantics = [#tpu.dimension_semantics<parallel>], iteration_bounds = array<i64: 1>, scalar_prefetch = 0 : i64, scratch_operands = 0 : i64, tpu.core_type = #tpu.core_type<tc>, window_params = [{transform_indices = @transform_0, window_bounds = array<i64: 128, 17>}, {transform_indices = @transform_1, window_bounds = array<i64: 128, 4>}, {pipeline_mode = #tpu.pipeline_mode<synchronous>, transform_indices = @transform_2, window_bounds = array<i64: 17, 224>}, {pipeline_mode = #tpu.pipeline_mode<synchronous>, transform_indices = @transform_3, window_bounds = array<i64: 1, 32>}, {transform_indices = @transform_4, window_bounds = array<i64: 1>}, {transform_indices = @transform_5, window_bounds = array<i64: 1, 128>}]} {
    %c0 = arith.constant 0 : index
    %c0_0 = arith.constant 0 : index
    %0 = vector.load %arg1[%c0, %c0_0] : memref<128x17xf32, #tpu.memory_space<vmem>>, vector<128x17xf32>
    %c0_1 = arith.constant 0 : index
    %c0_2 = arith.constant 0 : index
    %1 = vector.load %arg2[%c0_1, %c0_2] : memref<128x4xf32, #tpu.memory_space<vmem>>, vector<128x4xf32>
    %c0_3 = arith.constant 0 : index
    %c0_4 = arith.constant 0 : index
    %2 = vector.load %arg3[%c0_3, %c0_4] : memref<17x224xf32, #tpu.memory_space<vmem>>, vector<17x224xf32>
    %cst = arith.constant dense<0.000000e+00> : vector<128x224xf32>
    %3 = tpu.matmul %0, %2, %cst {dimension_numbers = #tpu.dot_dimension_numbers<[1], [0], [0], [1], [0, 0, 1, 1], [], []>} : vector<128x17xf32>, vector<17x224xf32>, vector<128x224xf32> -> vector<128x224xf32>
    %4 = vector.extract_strided_slice %3 {offsets = [0, 0], sizes = [128, 128], strides = [1, 1]} : vector<128x224xf32> to vector<128x128xf32>
    %5 = math.absf %4 : vector<128x128xf32>
    %6 = vector.extract_strided_slice %3 {offsets = [0, 128], sizes = [128, 32], strides = [1, 1]} : vector<128x224xf32> to vector<128x32xf32>
    %7 = vector.extract_strided_slice %3 {offsets = [0, 160], sizes = [128, 32], strides = [1, 1]} : vector<128x224xf32> to vector<128x32xf32>
    %8 = math.absf %7 : vector<128x32xf32>
    %9 = vector.extract_strided_slice %3 {offsets = [0, 192], sizes = [128, 32], strides = [1, 1]} : vector<128x224xf32> to vector<128x32xf32>
    %cst_5 = arith.constant 0.000000e+00 : f32
    %10 = vector.broadcast %cst_5 : f32 to vector<128x32xf32>
    %11 = arith.maximumf %9, %10 : vector<128x32xf32>
    %12 = vector.extract_strided_slice %1 {offsets = [0, 0], sizes = [128, 1], strides = [1, 1]} : vector<128x4xf32> to vector<128x1xf32>
    %13 = vector.extract_strided_slice %5 {offsets = [0, 0], sizes = [128, 32], strides = [1, 1]} : vector<128x128xf32> to vector<128x32xf32>
    %14 = vector.broadcast %12 : vector<128x1xf32> to vector<128x32xf32>
    %15 = arith.mulf %14, %13 : vector<128x32xf32>
    %16 = arith.addf %6, %15 : vector<128x32xf32>
    %17 = vector.extract_strided_slice %1 {offsets = [0, 1], sizes = [128, 1], strides = [1, 1]} : vector<128x4xf32> to vector<128x1xf32>
    %18 = vector.extract_strided_slice %5 {offsets = [0, 32], sizes = [128, 32], strides = [1, 1]} : vector<128x128xf32> to vector<128x32xf32>
    %19 = vector.broadcast %17 : vector<128x1xf32> to vector<128x32xf32>
    %20 = arith.mulf %19, %18 : vector<128x32xf32>
    %21 = arith.addf %16, %20 : vector<128x32xf32>
    %22 = vector.extract_strided_slice %1 {offsets = [0, 2], sizes = [128, 1], strides = [1, 1]} : vector<128x4xf32> to vector<128x1xf32>
    %23 = vector.extract_strided_slice %5 {offsets = [0, 64], sizes = [128, 32], strides = [1, 1]} : vector<128x128xf32> to vector<128x32xf32>
    %24 = vector.broadcast %22 : vector<128x1xf32> to vector<128x32xf32>
    %25 = arith.mulf %24, %23 : vector<128x32xf32>
    %26 = arith.addf %21, %25 : vector<128x32xf32>
    %27 = vector.extract_strided_slice %1 {offsets = [0, 3], sizes = [128, 1], strides = [1, 1]} : vector<128x4xf32> to vector<128x1xf32>
    %28 = vector.extract_strided_slice %5 {offsets = [0, 96], sizes = [128, 32], strides = [1, 1]} : vector<128x128xf32> to vector<128x32xf32>
    %29 = vector.broadcast %27 : vector<128x1xf32> to vector<128x32xf32>
    %30 = arith.mulf %29, %28 : vector<128x32xf32>
    %31 = arith.addf %26, %30 : vector<128x32xf32>
    %cst_6 = arith.constant 0.000000e+00 : f32
    %32 = vector.broadcast %cst_6 : f32 to vector<128x32xf32>
    %33 = arith.cmpf ogt, %31, %32 : vector<128x32xf32>
    %cst_7 = arith.constant 0.000000e+00 : f32
    %34 = vector.broadcast %cst_7 : f32 to vector<128x32xf32>
    %35 = arith.minimumf %31, %34 : vector<128x32xf32>
    %36 = math.exp %35 : vector<128x32xf32>
    %cst_8 = arith.constant 1.000000e+00 : f32
    %37 = vector.broadcast %cst_8 : f32 to vector<128x32xf32>
    %38 = arith.subf %36, %37 : vector<128x32xf32>
    %39 = arith.select %33, %31, %38 : vector<128x32xi1>, vector<128x32xf32>
    %40 = arith.mulf %8, %39 : vector<128x32xf32>
    %c0_9 = arith.constant 0 : index
    %c0_10 = arith.constant 0 : index
    %41 = vector.load %arg4[%c0_9, %c0_10] : memref<1x32xf32, #tpu.memory_space<vmem>>, vector<1x32xf32>
    %42 = vector.broadcast %41 : vector<1x32xf32> to vector<128x32xf32>
    %43 = arith.mulf %11, %42 : vector<128x32xf32>
    %44 = arith.addf %40, %43 : vector<128x32xf32>
    %cst_11 = arith.constant 1.000000e+00 : f32
    %45 = vector.broadcast %cst_11 : f32 to vector<1x32xf32>
    %cst_12 = arith.constant dense<0.000000e+00> : vector<1x128xf32>
    %46 = tpu.matmul %45, %44, %cst_12 {dimension_numbers = #tpu.dot_dimension_numbers<[1], [1], [0], [0], [0, 0, 1, 0], [], []>} : vector<1x32xf32>, vector<128x32xf32>, vector<1x128xf32> -> vector<1x128xf32>
    %c0_13 = arith.constant 0 : index
    %47 = memref.load %arg5[%c0_13] : memref<1xf32, #tpu.memory_space<smem>>
    %48 = vector.broadcast %47 : f32 to vector<1x128xf32>
    %49 = arith.addf %46, %48 : vector<1x128xf32>
    %c0_14 = arith.constant 0 : index
    %c0_15 = arith.constant 0 : index
    %50 = vector.load %arg6[%c0_14, %c0_15] : memref<1x128xf32, #tpu.memory_space<vmem>>, vector<1x128xf32>
    tpu.vector_store %arg6[%c0_14, %c0_15], %49 {strides = array<i32>} : memref<1x128xf32, #tpu.memory_space<vmem>>, vector<1x128xf32>,
    return
  }
  func.func @transform_0(%arg0: i32) -> (i32, i32) {
    %c0_i32 = arith.constant 0 : i32
    %c0_i32_0 = arith.constant 0 : i32
    return %arg0, %c0_i32 : i32, i32
  }
  func.func @transform_1(%arg0: i32) -> (i32, i32) {
    %c0_i32 = arith.constant 0 : i32
    %c0_i32_0 = arith.constant 0 : i32
    return %arg0, %c0_i32 : i32, i32
  }
  func.func @transform_2(%arg0: i32) -> (i32, i32) {
    %c0_i32 = arith.constant 0 : i32
    %c0_i32_0 = arith.constant 0 : i32
    %c0_i32_1 = arith.constant 0 : i32
    return %c0_i32, %c0_i32_0 : i32, i32
  }
  func.func @transform_3(%arg0: i32) -> (i32, i32) {
    %c0_i32 = arith.constant 0 : i32
    %c0_i32_0 = arith.constant 0 : i32
    %c0_i32_1 = arith.constant 0 : i32
    return %c0_i32, %c0_i32_0 : i32, i32
  }
  func.func @transform_4(%arg0: i32) -> i32 {
    %c0_i32 = arith.constant 0 : i32
    %c0_i32_0 = arith.constant 0 : i32
    return %c0_i32 : i32
  }
  func.func @transform_5(%arg0: i32) -> (i32, i32) {
    %c0_i32 = arith.constant 0 : i32
    %c0_i32_0 = arith.constant 0 : i32
    return %c0_i32, %arg0 : i32, i32
  }
}

</mosaic_0001>

<bundles_post_ra>
// kernel: tpu_custom_call.1
= control target key start
LH: loop header
LB: loop body
LE: loop exit
PB: predicated region body
PF: predicated region fallthrough
CT: control target
= control target key end

     0   :  { %v1647_v3 = vmov 2   ;;  %v2480_v7 = vmov 0.0   ;;  %vm109_vm0 = vcmask 1040384   ;;  %v1649_v10 = vmov 1   ;;  %s2474_s0 = inlined_call_operand.vmem [shape: f32[128,17], index: 0, kind: input, shape index: {}]   ;;  %s2475_s1 = inlined_call_operand.vmem [shape: f32[128,4], index: 1, kind: input, shape index: {}]   ;;  %s2476_s2 = inlined_call_operand.vmem [shape: f32[17,224], index: 2, kind: input, shape index: {}]   ;;  %s2477_s3 = inlined_call_operand.vmem [shape: f32[1,32], index: 3, kind: input, shape index: {}]   ;;  %s2478_s4 = inlined_call_operand.<no memory space> [shape: f32[1], index: 4, kind: input, shape index: {}]   ;;  %s2479_s5 = inlined_call_operand.hbm [shape: f32[1,128], index: 5, kind: output, shape index: {}]  }
   0x1   :  { %v1692_v0 = vld [vmem:[%s2475_s1] sm:$0xff]  ;;  %v55_v1 = vld [vmem:[%s2476_s2 + $0x8] sm:$0xff]  ;;  %v57_v2 = vld [vmem:[%s2476_s2 + $0x18] sm:$0xff]  ;;  %1522 = vset.pattern.permute.xlu1 %v1647_v3  ;;  %180 = vmatprep.mubr.f32.mxu0 %v2480_v7  ;;  %vm60_vm1 = vcmask 138240   ;;  %v1650_v14 = vmov 3  }
   0x2   :  { %v1473_v4 = vpack.c.bf16 %v57_v2, %v55_v1  ;;  %v54_v5 = vld [vmem:[%s2476_s2] sm:$0xff]  ;;  %v56_v6 = vld [vmem:[%s2476_s2 + $0x10] sm:$0xff]  ;;  %598 = vperm.xlu1 %1522, %v1692_v0   ;;  %v59_v9 = vld [vmem:[%s2476_s2 + $0x28] sm:$0x1]  ;;  %1521 = vset.pattern.permute.xlu0 %v1649_v10 }
   0x3   :  { %v1475_v8 = vpack.c.bf16 %v56_v6, %v54_v5  ;;  %v1716_v11 = vld [vmem:[%s2475_s1 + $0x8] sm:$0xff]  ;;  %438 = vperm.xlu0 %1521, %v1692_v0   ;;  %v58_v12 = vld [vmem:[%s2476_s2 + $0x20] sm:$0x1]  ;;  %v1736_v16 = vld [vmem:[%s2475_s1 + $0x18] sm:$0xff] }
   0x4   :  { %1474 = vmatprep.subr.bf16.mxu0 %v1473_v4  ;;  %v22_v13 = vld [vmem:[%s2474_s0] sm:$0xff]  ;;  %v23_v15 = vld [vmem:[%s2474_s0 + $0x8] sm:$0xff] }
   0x5   :  { %1476 = vmatpush1.bf16.msra.mxu0 %v1475_v8  ;;  %v1743_v17 = vld [vmem:[%s2475_s1 + $0x28] sm:$0xff] }
   0x6   :  { %1369 = vmatprep.subr.msk.mxu0 %vm109_vm0, %v59_v9  ;;  %602 = vperm.xlu1 %1522, %v1716_v11  }
   0x7   :  { %442 = vperm.xlu0 %1521, %v1716_v11  }
   0x9   :  { %1370 = vmatpush1.msk.msra.mxu0 %vm109_vm0, %v58_v12 }
   0xa   :  { %1371 = vmatmul.mubr.msk.f32.vlgmr.msra.gmra.mrb[0].mxu0 %vm60_vm1, %v22_v13  ;;  %1523 = vset.pattern.permute.xlu1 %v1650_v14 }
   0xb   :  { %186 = vmatprep.mubr.f32.mxu0 %v2480_v7  ;;  %762 = vperm.xlu1 %1523, %v1716_v11  }
   0xc   :  { %450 = vperm.xlu0 %1521, %v1736_v16  }
   0xd   :  { %11 = vsyncpa [#allocation4], 0  ;;  %v1749_v18 = vld [vmem:[%s2475_s1 + $0x10] sm:$0xff]  ;;  %v1761_v20 = vld [vmem:[%s2475_s1 + $0x38] sm:$0xff]  ;;  %v1651_v44 = vmov 0   ;;  %s1652_s16 = smov 64  }
   0xe   :  { %1372 = vmatmul.mubr.msk.f32.gmra.mrb[2].mxu0 %vm60_vm1, %v23_v15  ;;  %v24_v19 = vld [vmem:[%s2474_s0 + $0x10] sm:$0xff]  ;;  %v25_v21 = vld [vmem:[%s2474_s0 + $0x18] sm:$0xff]  ;;  %v1773_v22 = vld [vmem:[%s2475_s1 + $0x48] sm:$0xff]  ;;  %s1654_s17 = smov 32   ;;  %s1658_s20 = smov [#allocation3]  }
   0xf   :  { %192 = vmatprep.mubr.f32.mxu0 %v2480_v7  ;;  %1524 = vset.pattern.permute.xlu1 %v1649_v10  ;;  %v26_v23 = vld [vmem:[%s2474_s0 + $0x20] sm:$0xff]  ;;  %v1785_v24 = vld [vmem:[%s2475_s1 + $0x58] sm:$0xff]  ;;  %v27_v25 = vld [vmem:[%s2474_s0 + $0x28] sm:$0xff]  ;;  %s1361_s21 = sshll.u32 %s1658_s20, 4  ;;  %s1362_s21 = int_to_ptr.vmem [resolvable:$true] %s1361_s21 }
  0x10   :  { %458 = vperm.xlu0 %1521, %v1743_v17   ;;  %446 = vperm.xlu1 %1524, %v1749_v18   ;;  %v1797_v26 = vld [vmem:[%s2475_s1 + $0x68] sm:$0xff]  ;;  %v28_v27 = vld [vmem:[%s2474_s0 + $0x30] sm:$0xff]  ;;  %v1810_v28 = vld [vmem:[%s2475_s1 + $0x20] sm:$0xff]  ;;  %s1623_s22 = scalar_lea.vmem %s1362_s21, 16  ;;  %s1627_s23 = scalar_lea.vmem %s1362_s21, 32 }
  0x11   :  { %v1816_v29 = vld [vmem:[%s2475_s1 + $0x70] sm:$0xff]  ;;  %v29_v30 = vld [vmem:[%s2474_s0 + $0x38] sm:$0xff]  ;;  %v30_v31 = vld [vmem:[%s2474_s0 + $0x40] sm:$0xff]  ;;  %p1624_p0 = scmp.ne.s32.totalorder %s1362_s21, %s1623_s22  ;;  %p1628_p1 = scmp.lt.s32.totalorder %s1362_s21, %s1362_s21 }
  0x12   :  { %1373 = vmatmul.mubr.msk.f32.gmra.mrb[4].mxu0 %vm60_vm1, %v24_v19  ;;  %v31_v32 = vld [vmem:[%s2474_s0 + $0x48] sm:$0xff]  ;;  %v32_v33 = vld [vmem:[%s2474_s0 + $0x50] sm:$0xff]  ;;  %v33_v34 = vld [vmem:[%s2474_s0 + $0x58] sm:$0xff]  ;;  %p1629_p2 = scmp.lt.s32.totalorder %s1627_s23, %s1623_s22 }
  0x13   :  { %198 = vmatprep.mubr.f32.mxu0 %v2480_v7  ;;  %v1858_v35 = vld [vmem:[%s2475_s1 + $0x30] sm:$0xff]  ;;  %v34_v36 = vld [vmem:[%s2474_s0 + $0x60] sm:$0xff]  ;;  %v35_v37 = vld [vmem:[%s2474_s0 + $0x68] sm:$0xff] }
  0x14   :  { %466 = vperm.xlu0 %1521, %v1761_v20   ;;  %1525 = vset.pattern.permute.xlu1 %v1647_v3  ;;  %v1877_v38 = vld [vmem:[%s2475_s1 + $0x40] sm:$0xff]  ;;  %v48_v39 = vld [vmem:[%s2475_s1 + $0x50] sm:$0xff]  ;;  %v37_v42 = vld [vmem:[%s2474_s0 + $0x78] sm:$0xff]  ;;  %p1630_p3 = por %p1629_p2, %p1628_p1 }
  0x15   :  { %606 = vperm.xlu1 %1525, %v1749_v18   ;;  %v36_v40 = vld [vmem:[%s2474_s0 + $0x70] sm:$0xff]  ;;  %v50_v41 = vld [vmem:[%s2475_s1 + $0x60] sm:$0xff]  ;;  %v1903_v43 = vld [vmem:[%s2475_s1 + $0x78] sm:$0xff] }
  0x16   :  { %1374 = vmatmul.mubr.msk.f32.gmra.mrb[6].mxu0 %vm60_vm1, %v25_v21  ;;  %v1403_v63 = vld [vmem:[%s2477_s3] ss:$0 sm:$0xff]  ;;  %s1653_s3 = smov 96   ;;  %p1631_p4 = pnand %p1630_p3, %p1624_p0 }
  0x17   :  { %204 = vmatprep.mubr.f32.mxu0 %v2480_v7 }
  0x18   :  { %474 = vperm.xlu0 %1521, %v1773_v22  }
  0x19   :  { %610 = vperm.xlu1 %1525, %v1736_v16  }
  0x1a   :  { %1375 = vmatmul.mubr.msk.f32.gmra.mrb[8].mxu0 %vm60_vm1, %v26_v23 }
  0x1b   :  { %210 = vmatprep.mubr.f32.mxu0 %v2480_v7 }
  0x1c   :  { %482 = vperm.xlu0 %1521, %v1785_v24  }
  0x1d   :  { %1526 = vset.pattern.permute.xlu1 %v1650_v14 }
  0x1e   :  { %1376 = vmatmul.mubr.msk.f32.gmra.mrb[10].mxu0 %vm60_vm1, %v27_v25  ;;  %770 = vperm.xlu1 %1526, %v1736_v16  }
  0x1f   :  { %216 = vmatprep.mubr.f32.mxu0 %v2480_v7 }
  0x20   :  { %490 = vperm.xlu0 %1521, %v1797_v26  }
  0x22   :  { %1377 = vmatmul.mubr.msk.f32.gmra.mrb[12].mxu0 %vm60_vm1, %v28_v27  ;;  %1527 = vset.pattern.permute.xlu1 %v1649_v10 }
  0x23   :  { %222 = vmatprep.mubr.f32.mxu0 %v2480_v7  ;;  %454 = vperm.xlu1 %1527, %v1810_v28  }
  0x24   :  { %1544 = vset.pattern.permute.xlu0 %v1647_v3 }
  0x25   :  { %654 = vperm.xlu0 %1544, %v1816_v29  }
  0x26   :  { %1378 = vmatmul.mubr.msk.f32.gmra.mrb[14].mxu0 %vm60_vm1, %v29_v30 }
  0x27   :  { %228 = vmatprep.mubr.f32.mxu0 %v2480_v7  ;;  %1528 = vset.pattern.permute.xlu1 %v1647_v3 }
  0x28   :  { %614 = vperm.xlu1 %1528, %v1810_v28  }
  0x29   :  { %1545 = vset.pattern.permute.xlu0 %v1650_v14 }
  0x2a   :  { %1379 = vmatmul.mubr.msk.f32.gmra.mrb[16].mxu0 %vm60_vm1, %v30_v31  ;;  %758 = vperm.xlu0 %1545, %v1692_v0  }
  0x2b   :  { %234 = vmatprep.mubr.f32.mxu0 %v2480_v7 }
  0x2c   :  { %618 = vperm.xlu1 %1528, %v1743_v17  }
  0x2e   :  { %1380 = vmatmul.mubr.msk.f32.gmra.mrb[18].mxu0 %vm60_vm1, %v31_v32  ;;  %766 = vperm.xlu0 %1545, %v1749_v18  }
  0x2f   :  { %240 = vmatprep.mubr.f32.mxu0 %v2480_v7 }
  0x30   :  { %1529 = vset.pattern.permute.xlu1 %v1650_v14 }
  0x31   :  { %778 = vperm.xlu1 %1529, %v1743_v17  }
  0x32   :  { %1381 = vmatmul.mubr.msk.f32.gmra.mrb[20].mxu0 %vm60_vm1, %v32_v33  ;;  %774 = vperm.xlu0 %1545, %v1810_v28  }
  0x33   :  { %246 = vmatprep.mubr.f32.mxu0 %v2480_v7 }
  0x35   :  { %1530 = vset.pattern.permute.xlu1 %v1649_v10 }
  0x36   :  { %1382 = vmatmul.mubr.msk.f32.gmra.mrb[22].mxu0 %vm60_vm1, %v33_v34  ;;  %462 = vperm.xlu1 %1530, %v1858_v35  }
  0x37   :  { %252 = vmatprep.mubr.f32.mxu0 %v2480_v7  ;;  %782 = vperm.xlu0 %1545, %v1858_v35  }
  0x3a   :  { %1383 = vmatmul.mubr.msk.f32.gmra.mrb[24].mxu0 %vm60_vm1, %v34_v36  ;;  %1531 = vset.pattern.permute.xlu1 %v1647_v3 }
  0x3b   :  { %258 = vmatprep.mubr.f32.mxu0 %v2480_v7  ;;  %622 = vperm.xlu1 %1531, %v1858_v35  }
  0x3c   :  { %790 = vperm.xlu0 %1545, %v1877_v38  }
  0x3e   :  { %1384 = vmatmul.mubr.msk.f32.gmra.mrb[26].mxu0 %vm60_vm1, %v35_v37 }
  0x3f   :  { %264 = vmatprep.mubr.f32.mxu0 %v2480_v7  ;;  %626 = vperm.xlu1 %1531, %v1761_v20  }
  0x40   :  { %798 = vperm.xlu0 %1545, %v48_v39  }
  0x42   :  { %1385 = vmatmul.mubr.msk.f32.gmra.mrb[28].mxu0 %vm60_vm1, %v36_v40 }
  0x43   :  { %270 = vmatprep.mubr.f32.mxu0 %v2480_v7  ;;  %1532 = vset.pattern.permute.xlu1 %v1650_v14 }
  0x44   :  { %806 = vperm.xlu0 %1545, %v50_v41   ;;  %786 = vperm.xlu1 %1532, %v1761_v20  }
  0x46   :  { %1386 = vmatmul.mubr.msk.f32.gmra.mrb[30].mxu0 %vm60_vm1, %v37_v42 }
  0x48   :  { %818 = vperm.xlu0 %1545, %v1903_v43   ;;  %1533 = vset.pattern.permute.xlu1 %v1649_v10 }
  0x49   :  { %470 = vperm.xlu1 %1533, %v1877_v38  }
  0x4c   :  { %1548 = vset.pattern.permute.xlu0 %v1651_v44 }
  0x4d   :  { %332 = vperm.xlu0 %1548, %v1716_v11   ;;  %1534 = vset.pattern.permute.xlu1 %v1647_v3 }
  0x4e   :  { %630 = vperm.xlu1 %1534, %v1877_v38  }
  0x51   :  { %347 = vperm.xlu0 %1548, %v1810_v28  }
  0x52   :  { %634 = vperm.xlu1 %1534, %v1773_v22  }
  0x55   :  { %362 = vperm.xlu0 %1548, %v1761_v20  }
  0x56   :  { %1535 = vset.pattern.permute.xlu1 %v1650_v14 }
  0x57   :  { %794 = vperm.xlu1 %1535, %v1773_v22  }
  0x59   :  { %372 = vperm.xlu0 %1548, %v1773_v22  }
  0x5b   :  { %1536 = vset.pattern.permute.xlu1 %v1649_v10 }
  0x5c   :  { %478 = vperm.xlu1 %1536, %v48_v39  }
  0x5d   :  { %377 = vperm.xlu0 %1548, %v48_v39  }
  0x60   :  { %1537 = vset.pattern.permute.xlu1 %v1647_v3 }
  0x61   :  { %387 = vperm.xlu0 %1548, %v50_v41   ;;  %638 = vperm.xlu1 %1537, %v48_v39  }
  0x65   :  { %397 = vperm.xlu0 %1548, %v1816_v29   ;;  %642 = vperm.xlu1 %1537, %v1785_v24  }
  0x69   :  { %1590 = vset.pattern.permute.xlu0 %v1650_v14  ;;  %1538 = vset.pattern.permute.xlu1 %v1650_v14 }
  0x6a   :  { %802 = vperm.xlu1 %1538, %v1785_v24  }
  0x6e   :  { %1539 = vset.pattern.permute.xlu1 %v1649_v10 }
  0x6f   :  { %486 = vperm.xlu1 %1539, %v50_v41  }
  0x73   :  { %1540 = vset.pattern.permute.xlu1 %v1647_v3 }
  0x74   :  { %646 = vperm.xlu1 %1540, %v50_v41  }
  0x78   :  { %650 = vperm.xlu1 %1540, %v1797_v26  }
  0x7c   :  { %1541 = vset.pattern.permute.xlu1 %v1650_v14 }
  0x7d   :  { %810 = vperm.xlu1 %1541, %v1797_v26  }
  0x81   :  { %1542 = vset.pattern.permute.xlu1 %v1651_v44  ;;  %v1930_v45 = vpop.permute.xlu1 %598 }
  0x82   :  { %327 = vperm.xlu1 %1542, %v1692_v0   ;;  %v439_v46 = vpop.permute.xlu0 %438 }
  0x85   :  { %v1933_v47 = vpop.permute.xlu1 %602 }
  0x86   :  { %1543 = vset.pattern.permute.xlu1 %v1649_v10  ;;  %v1936_v48 = vpop.permute.xlu0 %442 }
  0x87   :  { %494 = vperm.xlu1 %1543, %v1816_v29  }
  0x8a   :  { %v1939_v49 = vpop.permute.xlu1 %762 }
  0x8b   :  { %v1941_v50 = vpop.permute.xlu0 %450  ;;  %498 = vperm.xlu1 %1543, %v1903_v43  }
  0x8f   :  { %v1944_v51 = vpop.permute.xlu0 %458  ;;  %1546 = vset.pattern.permute.xlu1 %v1647_v3  ;;  %v1947_v52 = vpop.permute.xlu1 %446 }
  0x90   :  { %658 = vperm.xlu1 %1546, %v1903_v43  }
  0x93   :  { %v1950_v53 = vpop.permute.xlu0 %466 }
  0x94   :  { %1547 = vset.pattern.permute.xlu1 %v1650_v14  ;;  %v1953_v54 = vpop.permute.xlu1 %606 }
  0x95   :  { %814 = vperm.xlu1 %1547, %v1816_v29  }
  0x97   :  { %v1956_v55 = vpop.permute.xlu0 %474 }
  0x98   :  { %v1958_v56 = vpop.permute.xlu1 %610 }
  0x99   :  { %1549 = vset.pattern.permute.xlu1 %v1651_v44 }
  0x9a   :  { %337 = vperm.xlu1 %1549, %v1749_v18  }
  0x9b   :  { %v1963_v58 = vpop.permute.xlu0 %482 }
  0x9d   :  { %v1961_v57 = vpop.permute.xlu1 %770 }
  0x9e   :  { %342 = vperm.xlu1 %1549, %v1736_v16  }
  0x9f   :  { %v1969_v60 = vpop.permute.xlu0 %490 }
  0xa2   :  { %352 = vperm.xlu1 %1549, %v1743_v17   ;;  %v1967_v59 = vpop.permute.xlu1 %454 }
  0xa4   :  { %v1974_v62 = vpop.permute.xlu0 %654 }
  0xa6   :  { %357 = vperm.xlu1 %1549, %v1858_v35  }
  0xa7   :  { %v1972_v61 = vpop.permute.xlu1 %614 }
  0xa9   :  { %v759_v1 = vpop.permute.xlu0 %758 }
  0xaa   :  { %367 = vperm.xlu1 %1549, %v1877_v38  }
  0xab   :  { %v1980_v0 = vpop.permute.xlu1 %618 }
  0xad   :  { %v1988_v4 = vpop.permute.xlu0 %766 }
  0xae   :  { %1099 = vrot.lane.b32.xlu1 %v1403_v63, %s1652_s16 }
  0xb0   :  { %v1983_v2 = vpop.permute.xlu1 %778 }
  0xb1   :  { %v1994_v6 = vpop.permute.xlu0 %774 }
  0xb2   :  { %382 = vperm.xlu1 %1549, %v1785_v24  }
  0xb5   :  { %v1986_v3 = vpop.permute.xlu1 %462 }
  0xb6   :  { %392 = vperm.xlu1 %1549, %v1797_v26   ;;  %v1998_v9 = vpop.permute.xlu0 %782 }
  0xba   :  { %402 = vperm.xlu1 %1549, %v1903_v43   ;;  %v1992_v5 = vpop.permute.xlu1 %622 }
  0xbb   :  { %v2002_v11 = vpop.permute.xlu0 %790 }
  0xbe   :  { %v1996_v8 = vpop.permute.xlu1 %626 }
  0xbf   :  { %v2008_v14 = vpop.permute.xlu0 %798 }
  0xc3   :  { %v2000_v10 = vpop.permute.xlu1 %786  ;;  %v2012_v16 = vpop.permute.xlu0 %806 }
  0xc7   :  { %v2016_v18 = vpop.permute.xlu0 %818 }
  0xc8   :  { %v2004_v12 = vpop.permute.xlu1 %470 }
  0xcc   :  { %v333_v24 = vpop.permute.xlu0 %332 }
  0xcd   :  { %v2006_v13 = vpop.permute.xlu1 %630 }
  0xd1   :  { %v2010_v15 = vpop.permute.xlu1 %634 }
  0xd6   :  { %v2014_v17 = vpop.permute.xlu1 %794 }
  0xdb   :  { %v2018_v19 = vpop.permute.xlu1 %478 }
  0xdd   :  { %v182_v20 = vpop.f32.mrb[0].mxu0 }
  0xde   :  { %v2020_v21 = vand.u32 2147483647, %v182_v20  ;;  %v2022_v22 = vpop.f32.mrb[1].mxu0 }
  0xe0   :  { %v501_v23 = vmul.f32 %v439_v46, %v2020_v21  ;;  %v2025_v26 = vpop.permute.xlu1 %638  ;;  %v661_v30 = vmul.f32 %v1930_v45, %v2020_v21  ;;  %v821_v36 = vmul.f32 %v759_v1, %v2020_v21  ;;  %v348_v46 = vpop.permute.xlu0 %347 }
  0xe1   :  { %v188_v25 = vpop.f32.mrb[2].mxu0 }
  0xe2   :  { %v278_v27 = vand.u32 2147483647, %v188_v25  ;;  %533 = vrot.lane.b32.xlu0 %v501_v23, %s1653_s3  ;;  %v2028_v28 = vpop.f32.mrb[3].mxu0 }
  0xe4   :  { %v406_v29 = vmul.f32 %v333_v24, %v278_v27  ;;  %v502_v31 = vmul.f32 %v1936_v48, %v278_v27  ;;  %v2033_v33 = vpop.permute.xlu1 %642  ;;  %v662_v37 = vmul.f32 %v1933_v47, %v278_v27  ;;  %v822_v43 = vmul.f32 %v1939_v49, %v278_v27 }
  0xe5   :  { %v194_v32 = vpop.f32.mrb[4].mxu0 }
  0xe6   :  { %693 = vrot.lane.b32.xlu0 %v661_v30, %s1652_s16  ;;  %535 = vrot.lane.b32.xlu1 %v502_v31, %s1653_s3  ;;  %v2037_v34 = vpop.f32.mrb[5].mxu0  ;;  %v2040_v35 = vadd.f32 %v406_v29, %v2028_v28  ;;  %v2052_v42 = vand.u32 2147483647, %v194_v32 }
  0xe8   :  { %v503_v1 = vmul.f32 %v1947_v52, %v2052_v42  ;;  %v663_v52 = vmul.f32 %v1953_v54, %v2052_v42  ;;  %v823_v32 = vmul.f32 %v1988_v4, %v2052_v42  ;;  %v363_v54 = vpop.permute.xlu0 %362 }
  0xe9   :  { %v200_v38 = vpop.f32.mrb[6].mxu0  ;;  %v2050_v41 = vpop.permute.xlu1 %802 }
  0xea   :  { %v2044_v39 = vand.u32 2147483647, %v200_v38  ;;  %853 = vrot.lane.b32.xlu0 %v821_v36, %s1654_s17  ;;  %695 = vrot.lane.b32.xlu1 %v662_v37, %s1652_s16  ;;  %v2048_v40 = vpop.f32.mrb[7].mxu0 }
  0xec   :  { %v504_v44 = vmul.f32 %v1941_v50, %v2044_v39  ;;  %v664_v49 = vmul.f32 %v1958_v56, %v2044_v39  ;;  %v824_v56 = vmul.f32 %v1961_v57, %v2044_v39 }
  0xed   :  { %v206_v45 = vpop.f32.mrb[8].mxu0 }
  0xee   :  { %v281_v47 = vand.u32 2147483647, %v206_v45  ;;  %855 = vrot.lane.b32.xlu1 %v822_v43, %s1654_s17  ;;  %539 = vrot.lane.b32.xlu0 %v504_v44, %s1653_s3  ;;  %v2059_v48 = vpop.f32.mrb[9].mxu0  ;;  %v2061_v63 = vpop.permute.xlu1 %486 }
  0xf0   :  { %v409_v20 = vmul.f32 %v348_v46, %v281_v47  ;;  %v505_v43 = vmul.f32 %v1967_v59, %v281_v47  ;;  %v665_v59 = vmul.f32 %v1972_v61, %v281_v47 }
  0xf1   :  { %v212_v23 = vpop.f32.mrb[10].mxu0 }
  0xf2   :  { %537 = vrot.lane.b32.xlu1 %v503_v1, %s1653_s3  ;;  %699 = vrot.lane.b32.xlu0 %v664_v49, %s1652_s16  ;;  %v2069_v50 = vpop.f32.mrb[11].mxu0  ;;  %v2072_v24 = vadd.f32 %v409_v20, %v2059_v48  ;;  %v2074_v25 = vand.u32 2147483647, %v212_v23  ;;  %v373_v23 = vpop.permute.xlu0 %372 }
  0xf3   :  { %v2076_v27 = vpop.permute.xlu1 %646 }
  0xf4   :  { %v506_v36 = vmul.f32 %v1944_v51, %v2074_v25  ;;  %v666_v44 = vmul.f32 %v1980_v0, %v2074_v25  ;;  %v826_v0 = vmul.f32 %v1983_v2, %v2074_v25 }
  0xf5   :  { %v218_v29 = vpop.f32.mrb[12].mxu0 }
  0xf6   :  { %697 = vrot.lane.b32.xlu1 %v663_v52, %s1652_s16  ;;  %859 = vrot.lane.b32.xlu0 %v824_v56, %s1654_s17  ;;  %v2084_v30 = vpop.f32.mrb[13].mxu0  ;;  %v2108_v49 = vand.u32 2147483647, %v218_v29  ;;  %v825_v29 = vmul.f32 %v1994_v6, %v281_v47 }
  0xf7   :  { %v2086_v31 = vpop.permute.xlu1 %650 }
  0xf8   :  { %v667_v61 = vmul.f32 %v1992_v5, %v2108_v49  ;;  %v827_v5 = vmul.f32 %v1998_v9, %v2108_v49  ;;  %v507_v47 = vmul.f32 %v1986_v3, %v2108_v49 }
  0xf9   :  { %v224_v37 = vpop.f32.mrb[14].mxu0 }
  0xfa   :  { %v284_v38 = vand.u32 2147483647, %v224_v37  ;;  %857 = vrot.lane.b32.xlu1 %v823_v32, %s1654_s17  ;;  %543 = vrot.lane.b32.xlu0 %v506_v36, %s1653_s3  ;;  %v2094_v57 = vpop.f32.mrb[15].mxu0 }
  0xfc   :  { %v412_v45 = vmul.f32 %v363_v54, %v284_v38  ;;  %v2099_v4 = vpop.permute.xlu1 %810  ;;  %v378_v54 = vpop.permute.xlu0 %377  ;;  %v668_v9 = vmul.f32 %v1996_v8, %v284_v38  ;;  %v508_v3 = vmul.f32 %v1950_v53, %v284_v38 }
  0xfd   :  { %v230_v46 = vpop.f32.mrb[16].mxu0 }
  0xfe   :  { %541 = vrot.lane.b32.xlu1 %v505_v43, %s1653_s3  ;;  %703 = vrot.lane.b32.xlu0 %v666_v44, %s1652_s16  ;;  %v2103_v51 = vpop.f32.mrb[17].mxu0  ;;  %v2106_v1 = vadd.f32 %v412_v45, %v2094_v57 }
 0x101   :  { %v236_v20 = vpop.f32.mrb[18].mxu0  ;;  %v328_v56 = vpop.permute.xlu1 %327 }
 0x102   :  { %v2113_v52 = vand.u32 2147483647, %v236_v20  ;;  %701 = vrot.lane.b32.xlu1 %v665_v59, %s1652_s16  ;;  %863 = vrot.lane.b32.xlu0 %v826_v0, %s1654_s17  ;;  %v2117_v32 = vpop.f32.mrb[19].mxu0  ;;  %v405_v36 = vmul.f32 %v328_v56, %v2020_v21 }
 0x104   :  { %v414_v2 = vmul.f32 %v373_v23, %v2113_v52  ;;  %v2125_v43 = vadd.f32 %v405_v36, %v2022_v22  ;;  %v2152_v36 = vand.u32 2147483647, %v230_v46 }
 0x105   :  { %v242_v37 = vpop.f32.mrb[20].mxu0 }
 0x106   :  { %v2127_v44 = vand.u32 2147483647, %v242_v37  ;;  %861 = vrot.lane.b32.xlu1 %v825_v29, %s1654_s17  ;;  %705 = vrot.lane.b32.xlu0 %v667_v61, %s1652_s16  ;;  %v2131_v45 = vpop.f32.mrb[21].mxu0  ;;  %v2134_v6 = vadd.f32 %v414_v2, %v2117_v32  ;;  %v2136_v21 = vpop.permute.xlu1 %494  ;;  %v509_v46 = vmul.f32 %v2004_v12, %v2152_v36 }
 0x107   :  { %v388_v61 = vpop.permute.xlu0 %387 }
 0x108   :  { %v415_v59 = vmul.f32 %v378_v54, %v2127_v44 }
 0x109   :  { %v248_v0 = vpop.f32.mrb[22].mxu0 }
 0x10a   :  { %865 = vrot.lane.b32.xlu0 %v827_v5, %s1654_s17  ;;  %545 = vrot.lane.b32.xlu1 %v507_v47, %s1653_s3  ;;  %v2145_v20 = vpop.f32.mrb[23].mxu0  ;;  %v2148_v23 = vadd.f32 %v415_v59, %v2131_v45  ;;  %v2150_v56 = vpop.permute.xlu1 %498  ;;  %v828_v5 = vmul.f32 %v2000_v10, %v284_v38  ;;  %v510_v10 = vmul.f32 %v1956_v55, %v2113_v52 }
 0x10b   :  { %v398_v38 = vpop.permute.xlu0 %397 }
 0x10d   :  { %v254_v29 = vpop.f32.mrb[24].mxu0 }
 0x10e   :  { %v2156_v2 = vand.u32 2147483647, %v254_v29  ;;  %707 = vrot.lane.b32.xlu1 %v668_v9, %s1652_s16  ;;  %547 = vrot.lane.b32.xlu0 %v508_v3, %s1653_s3  ;;  %v2160_v37 = vpop.f32.mrb[25].mxu0  ;;  %v669_v9 = vmul.f32 %v2006_v13, %v2152_v36  ;;  %v670_v13 = vmul.f32 %v2010_v15, %v2113_v52  ;;  %v830_v15 = vmul.f32 %v2014_v17, %v2113_v52 }
 0x10f   :  { %v2162_v54 = vpop.permute.xlu1 %658 }
 0x110   :  { %v417_v8 = vmul.f32 %v388_v61, %v2156_v2 }
 0x111   :  { %v260_v53 = vpop.f32.mrb[26].mxu0 }
 0x112   :  { %867 = vrot.lane.b32.xlu1 %v828_v5, %s1654_s17  ;;  %549 = vrot.lane.b32.xlu0 %v509_v46, %s1653_s3  ;;  %v2170_v47 = vpop.f32.mrb[27].mxu0  ;;  %v2173_v59 = vadd.f32 %v417_v8, %v2160_v37  ;;  %v829_v5 = vmul.f32 %v2002_v11, %v2152_v36  ;;  %v2202_v11 = vand.u32 2147483647, %v248_v0 }
 0x114   :  { %v2179_v3 = vpop.permute.xlu1 %814  ;;  %v512_v0 = vmul.f32 %v1963_v58, %v2202_v11 }
 0x115   :  { %v266_v12 = vpop.f32.mrb[28].mxu0 }
 0x116   :  { %v2181_v29 = vand.u32 2147483647, %v266_v12  ;;  %709 = vrot.lane.b32.xlu0 %v669_v9, %s1652_s16  ;;  %551 = vrot.lane.b32.xlu1 %v510_v10, %s1653_s3  ;;  %v2185_v61 = vpop.f32.mrb[29].mxu0 }
 0x117   :  { %2482 = vst [vmem:[#allocation6_spill] sm:$0xff] %v2185_v61 }
 0x118   :  { %v419_v55 = vmul.f32 %v398_v38, %v2181_v29  ;;  %v511_v38 = vmul.f32 %v2018_v19, %v2127_v44 }
 0x119   :  { %v2192_v46 = vpop.f32.mrb[30].mxu0  ;;  %v338_v8 = vpop.permute.xlu1 %337 }
 0x11a   :  { %869 = vrot.lane.b32.xlu0 %v829_v5, %s1654_s17  ;;  %711 = vrot.lane.b32.xlu1 %v670_v13, %s1652_s16  ;;  %v2196_v9 = vpop.f32.mrb[31].mxu0  ;;  %v2199_v10 = vadd.f32 %v419_v55, %v2185_v61  ;;  %v407_v12 = vmul.f32 %v338_v8, %v2052_v42  ;;  %v671_v42 = vmul.f32 %v2025_v26, %v2127_v44 }
 0x11b   :  { %v831_v55 = vmul.f32 %v2008_v14, %v2127_v44  ;;  %v513_v14 = vmul.f32 %v2061_v63, %v2156_v2 }
 0x11c   :  { %v2209_v7 = vadd.f32 %v407_v12, %v2037_v34  ;;  %v290_v12 = vand.u32 2147483647, %v260_v53  ;;  %v314_v53 = vmax.f32 %v2069_v50, 0.0 }
 0x11d   :  { %v343_v5 = vpop.permute.xlu1 %342 }
 0x11e   :  { %871 = vrot.lane.b32.xlu1 %v830_v15, %s1654_s17  ;;  %553 = vrot.lane.b32.xlu0 %v511_v38, %s1653_s3  ;;  %v408_v13 = vmul.f32 %v343_v5, %v2044_v39  ;;  %v672_v39 = vmul.f32 %v2033_v33, %v2202_v11  ;;  %v324_v38 = vmax.f32 %v2196_v9, 0.0  ;;  %v514_v63 = vmul.f32 %v1969_v60, %v290_v12 }
 0x11f   :  { %v315_v5 = vmax.f32 %v2084_v30, 0.0  ;;  %v322_v60 = vmax.f32 %v2170_v47, 0.0 }
 0x120   :  { %v2219_v17 = vadd.f32 %v408_v13, %v2048_v40  ;;  %v316_v13 = vmax.f32 %v2094_v57, 0.0 }
 0x121   :  { %v353_v19 = vpop.permute.xlu1 %352 }
 0x122   :  { %713 = vrot.lane.b32.xlu0 %v671_v42, %s1652_s16  ;;  %555 = vrot.lane.b32.xlu1 %v512_v0, %s1653_s3  ;;  %v410_v52 = vmul.f32 %v353_v19, %v2074_v25  ;;  %v832_v25 = vmul.f32 %v2050_v41, %v2202_v11  ;;  %v673_v41 = vmul.f32 %v2076_v27, %v2156_v2  ;;  %v317_v42 = vmax.f32 %v2103_v51, 0.0 }
 0x123   :  { %v319_v19 = vmax.f32 %v2131_v45, 0.0 }
 0x124   :  { %v2229_v26 = vadd.f32 %v410_v52, %v2069_v50  ;;  %v320_v52 = vmax.f32 %v2145_v20, 0.0 }
 0x125   :  { %v358_v58 = vpop.permute.xlu1 %357 }
 0x126   :  { %873 = vrot.lane.b32.xlu0 %v831_v55, %s1654_s17  ;;  %715 = vrot.lane.b32.xlu1 %v672_v39, %s1652_s16  ;;  %v411_v8 = vmul.f32 %v358_v58, %v2108_v49  ;;  %v313_v49 = vmax.f32 %v2059_v48, 0.0  ;;  %v321_v55 = vmax.f32 %v2160_v37, 0.0  ;;  %v323_v39 = vmax.f32 %v2185_v61, 0.0 }
 0x127   :  { %v833_v58 = vmul.f32 %v2012_v16, %v2156_v2 }
 0x128   :  { %v2239_v44 = vadd.f32 %v411_v8, %v2084_v30 }
 0x129   :  { %v368_v33 = vpop.permute.xlu1 %367 }
 0x12a   :  { %875 = vrot.lane.b32.xlu1 %v832_v25, %s1654_s17  ;;  %557 = vrot.lane.b32.xlu0 %v513_v14, %s1653_s3  ;;  %v413_v15 = vmul.f32 %v368_v33, %v2152_v36  ;;  %v318_v36 = vmax.f32 %v2117_v32, 0.0  ;;  %v674_v25 = vmul.f32 %v2086_v31, %v290_v12 }
 0x12c   :  { %v2254_v0 = vadd.f32 %v413_v15, %v2103_v51 }
 0x12d   :  { %v2260_v27 = vpop.permute.xlu1 %1099 }
 0x12e   :  { %717 = vrot.lane.b32.xlu0 %v673_v41, %s1652_s16  ;;  %559 = vrot.lane.b32.xlu1 %v514_v63, %s1653_s3  ;;  %v2269_v8 = vmul.f32 %v2260_v27, %v324_v38  ;;  %v2273_v14 = vmul.f32 %v2260_v27, %v314_v53  ;;  %v2276_v33 = vmul.f32 %v2260_v27, %v313_v49 }
 0x12f   :  { %v2279_v15 = vmul.f32 %v2260_v27, %v315_v5  ;;  %v2282_v41 = vmul.f32 %v2260_v27, %v316_v13  ;;  %v2285_v63 = vmul.f32 %v2260_v27, %v317_v42  ;;  %v2288_v16 = vmul.f32 %v2260_v27, %v318_v36 }
 0x130   :  { %v2291_v31 = vmul.f32 %v2260_v27, %v319_v19  ;;  %v2296_v38 = vmul.f32 %v2260_v27, %v320_v52  ;;  %v2299_v49 = vmul.f32 %v2260_v27, %v321_v55  ;;  %v2302_v53 = vmul.f32 %v2260_v27, %v322_v60 }
 0x131   :  { %v383_v2 = vpop.permute.xlu1 %382  ;;  %v2306_v13 = vmul.f32 %v2260_v27, %v323_v39  ;;  %v834_v42 = vmul.f32 %v2099_v4, %v290_v12  ;;  %v515_v36 = vmul.f32 %v2136_v21, %v2181_v29  ;;  %v292_v52 = vand.u32 2147483647, %v2192_v46 }
 0x132   :  { %877 = vrot.lane.b32.xlu0 %v833_v58, %s1654_s17  ;;  %719 = vrot.lane.b32.xlu1 %v674_v25, %s1652_s16  ;;  %v416_v5 = vmul.f32 %v383_v2, %v2202_v11  ;;  %v675_v11 = vmul.f32 %v1974_v62, %v2181_v29  ;;  %v835_v58 = vmul.f32 %v2179_v3, %v2181_v29 }
 0x133   :  { %v516_v39 = vmul.f32 %v2150_v56, %v292_v52  ;;  %v676_v25 = vmul.f32 %v2162_v54, %v292_v52  ;;  %v836_v62 = vmul.f32 %v2016_v18, %v292_v52 }
 0x134   :  { %v2312_v19 = vadd.f32 %v416_v5, %v2145_v20 }
 0x135   :  { %v393_v55 = vpop.permute.xlu1 %392 }
 0x136   :  { %879 = vrot.lane.b32.xlu1 %v834_v42, %s1654_s17  ;;  %561 = vrot.lane.b32.xlu0 %v515_v36, %s1653_s3  ;;  %v418_v60 = vmul.f32 %v393_v55, %v290_v12 }
 0x138   :  { %v2321_v4 = vadd.f32 %v418_v60, %v2170_v47 }
 0x139   :  { %v403_v21 = vpop.permute.xlu1 %402 }
 0x13a   :  { %721 = vrot.lane.b32.xlu0 %v675_v11, %s1652_s16  ;;  %563 = vrot.lane.b32.xlu1 %v516_v39, %s1653_s3  ;;  %v420_v46 = vmul.f32 %v403_v21, %v292_v52 }
 0x13c   :  { %v2329_v12 = vadd.f32 %v420_v46, %v2196_v9 }
 0x13e   :  { %881 = vrot.lane.b32.xlu0 %v835_v58, %s1654_s17  ;;  %723 = vrot.lane.b32.xlu1 %v676_v25, %s1652_s16 }
 0x142   :  { %883 = vrot.lane.b32.xlu1 %v836_v62, %s1654_s17 }
 0x154   :  { %v534_v56 = vpop.permute.xlu0 %533 }
 0x155   :  { %v581_v42 = vadd.f32 %v534_v56, %v2125_v43 }
 0x158   :  { %v694_v2 = vpop.permute.xlu0 %693  ;;  %v536_v5 = vpop.permute.xlu1 %535 }
 0x159   :  { %v741_v36 = vadd.f32 %v694_v2, %v581_v42  ;;  %v582_v54 = vadd.f32 %v536_v5, %v2040_v35 }
 0x15c   :  { %v854_v3 = vpop.permute.xlu0 %853  ;;  %v696_v29 = vpop.permute.xlu1 %695 }
 0x15d   :  { %v901_v55 = vadd.f32 %v854_v3, %v741_v36  ;;  %v742_v11 = vadd.f32 %v696_v29, %v582_v54 }
 0x15f   :  { %v933_v60 = vmin.f32 %v901_v55, 0.0  ;;  %vm917_vm2 = vcmp.gt.f32.partialorder %v901_v55, 0.0 }
 0x160   :  { %v856_v39 = vpop.permute.xlu1 %855  ;;  %v540_v21 = vpop.permute.xlu0 %539 }
 0x161   :  { %v949_v46 = vmul.f32 1.442695, %v933_v60  ;;  %v902_v58 = vadd.f32 %v856_v39, %v742_v11  ;;  %v584_v61 = vadd.f32 %v540_v21, %v2219_v17 }
 0x163   :  { %1591 = vpow2.f32 %v949_v46  ;;  %v934_v18 = vmin.f32 %v902_v58, 0.0  ;;  %vm918_vm3 = vcmp.gt.f32.partialorder %v902_v58, 0.0 }
 0x164   :  { %v538_v52 = vpop.permute.xlu1 %537  ;;  %v700_v25 = vpop.permute.xlu0 %699 }
 0x165   :  { %v951_v62 = vmul.f32 1.442695, %v934_v18  ;;  %v744_v43 = vadd.f32 %v700_v25, %v584_v61  ;;  %v583_v35 = vadd.f32 %v538_v52, %v2209_v7  ;;  %v309_v25 = vmax.f32 %v2022_v22, 0.0 }
 0x167   :  { %1593 = vpow2.f32 %v951_v62 }
 0x168   :  { %v698_v56 = vpop.permute.xlu1 %697  ;;  %v860_v2 = vpop.permute.xlu0 %859 }
 0x169   :  { %v904_v5 = vadd.f32 %v860_v2, %v744_v43  ;;  %v743_v42 = vadd.f32 %v698_v56, %v583_v35  ;;  %v1102_v56 = vmul.f32 %v2260_v27, %v309_v25 }
 0x16b   :  { %v936_v36 = vmin.f32 %v904_v5, 0.0  ;;  %vm920_vm4 = vcmp.gt.f32.partialorder %v904_v5, 0.0 }
 0x16c   :  { %v858_v3 = vpop.permute.xlu1 %857  ;;  %v544_v29 = vpop.permute.xlu0 %543 }
 0x16d   :  { %v1592_v54 = vpop.eup %1591  ;;  %v955_v60 = vmul.f32 1.442695, %v936_v36  ;;  %v903_v11 = vadd.f32 %v858_v3, %v743_v42  ;;  %v586_v7 = vadd.f32 %v544_v29, %v2229_v26  ;;  %v310_v36 = vmax.f32 %v2028_v28, 0.0 }
 0x16e   :  { %v1387_v39 = vadd.f32 -1.0, %v1592_v54 }
 0x16f   :  { %1595 = vpow2.f32 %v955_v60  ;;  %v935_v46 = vmin.f32 %v903_v11, 0.0  ;;  %v1103_v54 = vmul.f32 %v2260_v27, %v310_v36  ;;  %vm919_vm5 = vcmp.gt.f32.partialorder %v903_v11, 0.0 }
 0x170   :  { %v542_v18 = vpop.permute.xlu1 %541  ;;  %v704_v17 = vpop.permute.xlu0 %703  ;;  %v997_v21 = vsel %vm917_vm2, %v901_v55, %v1387_v39  ;;  %vm1656_vm2 = vmmov 0  }
 0x171   :  { %v1594_v61 = vpop.eup %1593  ;;  %v953_v62 = vmul.f32 1.442695, %v935_v46  ;;  %1029 = vrot.lane.b32.xlu0 %v997_v21, %s1654_s17  ;;  %v746_v43 = vadd.f32 %v704_v17, %v586_v7  ;;  %v585_v55 = vadd.f32 %v542_v18, %v2072_v24  ;;  %v312_v7 = vmax.f32 %v2048_v40, 0.0 }
 0x172   :  { %v1388_v52 = vadd.f32 -1.0, %v1594_v61 }
 0x173   :  { %1597 = vpow2.f32 %v953_v62 }
 0x174   :  { %v702_v2 = vpop.permute.xlu1 %701  ;;  %v864_v35 = vpop.permute.xlu0 %863  ;;  %v998_v42 = vsel %vm918_vm3, %v902_v58, %v1388_v52  ;;  %vm1248_vm3 = vcmask 261120  }
 0x175   :  { %v906_v3 = vadd.f32 %v864_v35, %v746_v43  ;;  %1134 = vrot.lane.b32.xlu0 %v1102_v56, %s1653_s3  ;;  %1031 = vrot.lane.b32.xlu1 %v998_v42, %s1654_s17  ;;  %v745_v26 = vadd.f32 %v702_v2, %v585_v55  ;;  %v1105_v35 = vmul.f32 %v2260_v27, %v312_v7 }
 0x177   :  { %v938_v29 = vmin.f32 %v906_v3, 0.0  ;;  %vm922_vm6 = vcmp.gt.f32.partialorder %v906_v3, 0.0 }
 0x178   :  { %v862_v60 = vpop.permute.xlu1 %861  ;;  %v706_v39 = vpop.permute.xlu0 %705 }
 0x179   :  { %v1596_v46 = vpop.eup %1595  ;;  %v959_v17 = vmul.f32 1.442695, %v938_v29  ;;  %v905_v21 = vadd.f32 %v862_v60, %v745_v26  ;;  %1136 = vrot.lane.b32.xlu1 %v1103_v54, %s1653_s3  ;;  %v311_v26 = vmax.f32 %v2037_v34, 0.0 }
 0x17a   :  { %v1390_v58 = vadd.f32 -1.0, %v1596_v46 }
 0x17b   :  { %1599 = vpow2.f32 %v959_v17  ;;  %v937_v24 = vmin.f32 %v905_v21, 0.0  ;;  %v1104_v60 = vmul.f32 %v2260_v27, %v311_v26  ;;  %vm921_vm7 = vcmp.gt.f32.partialorder %v905_v21, 0.0 }
 0x17c   :  { %v866_v18 = vpop.permute.xlu0 %865  ;;  %v546_v61 = vpop.permute.xlu1 %545  ;;  %v1000_v25 = vsel %vm920_vm4, %v904_v5, %v1390_v58  ;;  %vm2431_vm4 = vmpackc.low %vm1248_vm3, %vm1248_vm3 }
 0x17d   :  { %v1598_v62 = vpop.eup %1597  ;;  %v957_v52 = vmul.f32 1.442695, %v937_v24  ;;  %v587_v43 = vadd.f32 %v546_v61, %v2239_v44  ;;  %1035 = vrot.lane.b32.xlu1 %v1000_v25, %s1654_s17 }
 0x17e   :  { %v1389_v56 = vadd.f32 -1.0, %v1598_v62 }
 0x17f   :  { %1601 = vpow2.f32 %v957_v52  ;;  %v747_v2 = vadd.f32 %v706_v39, %v587_v43 }
 0x180   :  { %v708_v42 = vpop.permute.xlu1 %707  ;;  %v548_v36 = vpop.permute.xlu0 %547  ;;  %v999_v55 = vsel %vm919_vm5, %v903_v11, %v1389_v56 }
 0x181   :  { %v907_v5 = vadd.f32 %v866_v18, %v747_v2  ;;  %v588_v29 = vadd.f32 %v548_v36, %v2106_v1  ;;  %1033 = vrot.lane.b32.xlu0 %v999_v55, %s1654_s17  ;;  %1140 = vrot.lane.b32.xlu1 %v1105_v35, %s1653_s3 }
 0x183   :  { %v939_v44 = vmin.f32 %v907_v5, 0.0  ;;  %v748_v54 = vadd.f32 %v708_v42, %v588_v29  ;;  %vm923_vm8 = vcmp.gt.f32.partialorder %v907_v5, 0.0 }
 0x184   :  { %v868_v46 = vpop.permute.xlu1 %867  ;;  %v550_v39 = vpop.permute.xlu0 %549 }
 0x185   :  { %v1600_v17 = vpop.eup %1599  ;;  %v961_v58 = vmul.f32 1.442695, %v939_v44  ;;  %v908_v24 = vadd.f32 %v868_v46, %v748_v54  ;;  %1138 = vrot.lane.b32.xlu0 %v1104_v60, %s1653_s3  ;;  %v589_v52 = vadd.f32 %v550_v39, %v2254_v0 }
 0x186   :  { %v1392_v11 = vadd.f32 -1.0, %v1600_v17 }
 0x187   :  { %1603 = vpow2.f32 %v961_v58  ;;  %v940_v18 = vmin.f32 %v908_v24, 0.0  ;;  %vm924_vm9 = vcmp.gt.f32.partialorder %v908_v24, 0.0 }
 0x188   :  { %v710_v1 = vpop.permute.xlu0 %709  ;;  %v552_v61 = vpop.permute.xlu1 %551  ;;  %v1002_v25 = vsel %vm922_vm6, %v906_v3, %v1392_v11 }
 0x189   :  { %v1602_v62 = vpop.eup %1601  ;;  %v963_v7 = vmul.f32 1.442695, %v940_v18  ;;  %1039 = vrot.lane.b32.xlu1 %v1002_v25, %s1654_s17  ;;  %v749_v43 = vadd.f32 %v710_v1, %v589_v52  ;;  %v590_v42 = vadd.f32 %v552_v61, %v2134_v6 }
 0x18a   :  { %v1391_v27 = vadd.f32 -1.0, %v1602_v62 }
 0x18b   :  { %1605 = vpow2.f32 %v963_v7 }
 0x18c   :  { %v870_v56 = vpop.permute.xlu0 %869  ;;  %v712_v2 = vpop.permute.xlu1 %711  ;;  %v1001_v35 = vsel %vm921_vm7, %v905_v21, %v1391_v27 }
 0x18d   :  { %v909_v36 = vadd.f32 %v870_v56, %v749_v43  ;;  %1037 = vrot.lane.b32.xlu0 %v1001_v35, %s1654_s17  ;;  %1144 = vrot.lane.b32.xlu1 %v2273_v14, %s1653_s3  ;;  %v750_v55 = vadd.f32 %v712_v2, %v590_v42 }
 0x18f   :  { %v941_v3 = vmin.f32 %v909_v36, 0.0  ;;  %vm925_vm10 = vcmp.gt.f32.partialorder %v909_v36, 0.0 }
 0x190   :  { %v872_v0 = vpop.permute.xlu1 %871  ;;  %v554_v26 = vpop.permute.xlu0 %553 }
 0x191   :  { %v1604_v29 = vpop.eup %1603  ;;  %v965_v44 = vmul.f32 1.442695, %v941_v3  ;;  %v910_v54 = vadd.f32 %v872_v0, %v750_v55  ;;  %1142 = vrot.lane.b32.xlu0 %v2276_v33, %s1653_s3  ;;  %v591_v14 = vadd.f32 %v554_v26, %v2148_v23 }
 0x192   :  { %v1393_v60 = vadd.f32 -1.0, %v1604_v29 }
 0x193   :  { %1607 = vpow2.f32 %v965_v44  ;;  %v942_v21 = vmin.f32 %v910_v54, 0.0  ;;  %vm926_vm11 = vcmp.gt.f32.partialorder %v910_v54, 0.0 }
 0x194   :  { %v714_v6 = vpop.permute.xlu0 %713  ;;  %v556_v46 = vpop.permute.xlu1 %555  ;;  %v1003_v39 = vsel %vm923_vm8, %v907_v5, %v1393_v60 }
 0x195   :  { %v1606_v17 = vpop.eup %1605  ;;  %v967_v58 = vmul.f32 1.442695, %v942_v21  ;;  %1041 = vrot.lane.b32.xlu0 %v1003_v39, %s1654_s17  ;;  %v751_v18 = vadd.f32 %v714_v6, %v591_v14  ;;  %v592_v25 = vadd.f32 %v556_v46, %v2312_v19 }
 0x196   :  { %v1394_v11 = vadd.f32 -1.0, %v1606_v17 }
 0x197   :  { %1609 = vpow2.f32 %v967_v58 }
 0x198   :  { %v874_v1 = vpop.permute.xlu0 %873  ;;  %v716_v61 = vpop.permute.xlu1 %715  ;;  %v1004_v33 = vsel %vm924_vm9, %v908_v24, %v1394_v11 }
 0x199   :  { %v911_v62 = vadd.f32 %v874_v1, %v751_v18  ;;  %1146 = vrot.lane.b32.xlu0 %v2279_v15, %s1653_s3  ;;  %1043 = vrot.lane.b32.xlu1 %v1004_v33, %s1654_s17  ;;  %v752_v7 = vadd.f32 %v716_v61, %v592_v25 }
 0x19b   :  { %v943_v5 = vmin.f32 %v911_v62, 0.0  ;;  %vm927_vm12 = vcmp.gt.f32.partialorder %v911_v62, 0.0 }
 0x19c   :  { %v876_v23 = vpop.permute.xlu1 %875  ;;  %v558_v52 = vpop.permute.xlu0 %557 }
 0x19d   :  { %v1608_v27 = vpop.eup %1607  ;;  %v969_v43 = vmul.f32 1.442695, %v943_v5  ;;  %v912_v56 = vadd.f32 %v876_v23, %v752_v7  ;;  %1148 = vrot.lane.b32.xlu1 %v2282_v41, %s1653_s3  ;;  %v593_v55 = vadd.f32 %v558_v52, %v2173_v59 }
 0x19e   :  { %v1395_v2 = vadd.f32 -1.0, %v1608_v27 }
 0x19f   :  { %1611 = vpow2.f32 %v969_v43  ;;  %v944_v19 = vmin.f32 %v912_v56, 0.0  ;;  %vm928_vm13 = vcmp.gt.f32.partialorder %v912_v56, 0.0 }
 0x1a0   :  { %v718_v24 = vpop.permute.xlu0 %717  ;;  %v560_v35 = vpop.permute.xlu1 %559  ;;  %v1005_v42 = vsel %vm925_vm10, %v909_v36, %v1395_v2 }
 0x1a1   :  { %v1610_v15 = vpop.eup %1609  ;;  %v971_v3 = vmul.f32 1.442695, %v944_v19  ;;  %1045 = vrot.lane.b32.xlu0 %v1005_v42, %s1654_s17  ;;  %v753_v26 = vadd.f32 %v718_v24, %v593_v55  ;;  %v594_v60 = vadd.f32 %v560_v35, %v2321_v4 }
 0x1a2   :  { %v1396_v0 = vadd.f32 -1.0, %v1610_v15 }
 0x1a3   :  { %1613 = vpow2.f32 %v971_v3 }
 0x1a4   :  { %v878_v29 = vpop.permute.xlu0 %877  ;;  %v720_v44 = vpop.permute.xlu1 %719  ;;  %v1006_v41 = vsel %vm926_vm11, %v910_v54, %v1396_v0 }
 0x1a5   :  { %v913_v21 = vadd.f32 %v878_v29, %v753_v26  ;;  %1150 = vrot.lane.b32.xlu0 %v2285_v63, %s1653_s3  ;;  %1047 = vrot.lane.b32.xlu1 %v1006_v41, %s1654_s17  ;;  %v754_v6 = vadd.f32 %v720_v44, %v594_v60  ;;  %v1655_v44 = vmov 0.0|0.0   ;;  %v293_v41 = vand.u32 2147483647, %v2022_v22 }
 0x1a6   :  { %1477 = vmatprep.subr.bf16.mxu1 %v1655_v44  ;;  %v294_v60 = vand.u32 2147483647, %v2028_v28 }
 0x1a7   :  { %v945_v36 = vmin.f32 %v913_v21, 0.0  ;;  %vm929_vm14 = vcmp.gt.f32.partialorder %v913_v21, 0.0 }
 0x1a8   :  { %v880_v59 = vpop.permute.xlu1 %879  ;;  %v562_v46 = vpop.permute.xlu0 %561 }
 0x1a9   :  { %v1612_v39 = vpop.eup %1611  ;;  %v973_v17 = vmul.f32 1.442695, %v945_v36  ;;  %v914_v58 = vadd.f32 %v880_v59, %v754_v6  ;;  %1152 = vrot.lane.b32.xlu1 %v2288_v16, %s1653_s3  ;;  %v595_v61 = vadd.f32 %v562_v46, %v2199_v10 }
 0x1aa   :  { %v1397_v14 = vadd.f32 -1.0, %v1612_v39 }
 0x1ab   :  { %1615 = vpow2.f32 %v973_v17  ;;  %v946_v4 = vmin.f32 %v914_v58, 0.0  ;;  %vm930_vm15 = vcmp.gt.f32.partialorder %v914_v58, 0.0 }
 0x1ac   :  { %v722_v54 = vpop.permute.xlu0 %721  ;;  %v564_v11 = vpop.permute.xlu1 %563  ;;  %v1007_v18 = vsel %vm927_vm12, %v911_v62, %v1397_v14  ;;  %v295_v14 = vand.u32 2147483647, %v2037_v34 }
 0x1ad   :  { %v1614_v63 = vpop.eup %1613  ;;  %v975_v1 = vmul.f32 1.442695, %v946_v4  ;;  %1049 = vrot.lane.b32.xlu0 %v1007_v18, %s1654_s17  ;;  %v755_v25 = vadd.f32 %v722_v54, %v595_v61  ;;  %v596_v23 = vadd.f32 %v564_v11, %v2329_v12 }
 0x1ae   :  { %v1398_v33 = vadd.f32 -1.0, %v1614_v63 }
 0x1af   :  { %1617 = vpow2.f32 %v975_v1 }
 0x1b0   :  { %v882_v5 = vpop.permute.xlu0 %881  ;;  %v724_v7 = vpop.permute.xlu1 %723  ;;  %v1008_v16 = vsel %vm928_vm13, %v912_v56, %v1398_v33  ;;  %v298_v33 = vand.u32 2147483647, %v2069_v50 }
 0x1b1   :  { %v915_v52 = vadd.f32 %v882_v5, %v755_v25  ;;  %1154 = vrot.lane.b32.xlu0 %v2291_v31, %s1653_s3  ;;  %1051 = vrot.lane.b32.xlu1 %v1008_v16, %s1654_s17  ;;  %v756_v27 = vadd.f32 %v724_v7, %v596_v23  ;;  %v297_v25 = vand.u32 2147483647, %v2059_v48 }
 0x1b3   :  { %v947_v62 = vmin.f32 %v915_v52, 0.0  ;;  %vm931_vm0 = vcmp.gt.f32.partialorder %v915_v52, 0.0 }
 0x1b4   :  { %v884_v10 = vpop.permute.xlu1 %883 }
 0x1b5   :  { %v1616_v43 = vpop.eup %1615  ;;  %v977_v2 = vmul.f32 1.442695, %v947_v62  ;;  %v916_v19 = vadd.f32 %v884_v10, %v756_v27  ;;  %1156 = vrot.lane.b32.xlu1 %v2296_v38, %s1653_s3  ;;  %v299_v10 = vand.u32 2147483647, %v2084_v30 }
 0x1b6   :  { %v1399_v24 = vadd.f32 -1.0, %v1616_v43  ;;  %v300_v43 = vand.u32 2147483647, %v2094_v57 }
 0x1b7   :  { %1619 = vpow2.f32 %v977_v2  ;;  %v948_v56 = vmin.f32 %v916_v19, 0.0  ;;  %vm932_vm1 = vcmp.gt.f32.partialorder %v916_v19, 0.0 }
 0x1b8   :  { %v1009_v12 = vsel %vm929_vm14, %v913_v21, %v1399_v24 }
 0x1b9   :  { %v1618_v35 = vpop.eup %1617  ;;  %v979_v42 = vmul.f32 1.442695, %v948_v56  ;;  %1053 = vrot.lane.b32.xlu0 %v1009_v12, %s1654_s17 }
 0x1ba   :  { %v1400_v31 = vadd.f32 -1.0, %v1618_v35 }
 0x1bb   :  { %1621 = vpow2.f32 %v979_v42 }
 0x1bc   :  { %v1010_v15 = vsel %vm930_vm15, %v914_v58, %v1400_v31  ;;  %v296_v58 = vand.u32 2147483647, %v2048_v40  ;;  %v301_v31 = vand.u32 2147483647, %v2103_v51 }
 0x1bd   :  { %1158 = vrot.lane.b32.xlu0 %v2299_v49, %s1653_s3  ;;  %1055 = vrot.lane.b32.xlu1 %v1010_v15, %s1654_s17  ;;  %v302_v15 = vand.u32 2147483647, %v2117_v32 }
 0x1c1   :  { %v1620_v3 = vpop.eup %1619  ;;  %1160 = vrot.lane.b32.xlu1 %v2302_v53, %s1653_s3 }
 0x1c2   :  { %v1401_v38 = vadd.f32 -1.0, %v1620_v3 }
 0x1c4   :  { %v1011_v55 = vsel %vm931_vm0, %v915_v52, %v1401_v38 }
 0x1c5   :  { %v1622_v0 = vpop.eup %1621  ;;  %1057 = vrot.lane.b32.xlu0 %v1011_v55, %s1654_s17 }
 0x1c6   :  { %v1402_v26 = vadd.f32 -1.0, %v1622_v0 }
 0x1c8   :  { %v1012_v29 = vsel %vm932_vm1, %v916_v19, %v1402_v26 }
 0x1c9   :  { %1162 = vrot.lane.b32.xlu0 %v2306_v13, %s1653_s3  ;;  %1059 = vrot.lane.b32.xlu1 %v1012_v29, %s1654_s17 }
 0x1cd   :  { %1164 = vrot.lane.b32.xlu1 %v2269_v8, %s1653_s3 }
 0x1e3   :  { %v1030_v49 = vpop.permute.xlu0 %1029 }
 0x1e4   :  { %v1077_v36 = vmul.f32 %v1030_v49, %v293_v41  ;;  %v304_v41 = vand.u32 2147483647, %v2145_v20 }
 0x1e7   :  { %v1032_v53 = vpop.permute.xlu1 %1031  ;;  %v1135_v21 = vpop.permute.xlu0 %1134 }
 0x1e8   :  { %v1078_v6 = vmul.f32 %v1032_v53, %v294_v60  ;;  %v1182_v46 = vadd.f32 %v1135_v21, %v1077_v36  ;;  %v303_v53 = vand.u32 2147483647, %v2131_v45 }
 0x1eb   :  { %v1137_v59 = vpop.permute.xlu1 %1136 }
 0x1ec   :  { %v1183_v13 = vadd.f32 %v1137_v59, %v1078_v6 }
 0x1ee   :  { %v1550_v39 = vpack.i.bf16 %v1183_v13, %v1182_v46 }
 0x1ef   :  { %v1036_v17 = vpop.permute.xlu1 %1035 }
 0x1f0   :  { %1551 = vrot.lane.b32.xlu0 %v1550_v39, %s1653_s3  ;;  %v1080_v54 = vmul.f32 %v1036_v17, %v296_v58  ;;  %v305_v39 = vand.u32 2147483647, %v2160_v37  ;;  %v306_v17 = vand.u32 2147483647, %v2170_v47 }
 0x1f3   :  { %v1034_v8 = vpop.permute.xlu0 %1033  ;;  %v1141_v4 = vpop.permute.xlu1 %1140 }
 0x1f4   :  { %v1079_v22 = vmul.f32 %v1034_v8, %v295_v14  ;;  %v1185_v28 = vadd.f32 %v1141_v4, %v1080_v54 }
 0x1f7   :  { %v1139_v11 = vpop.permute.xlu0 %1138 }
 0x1f8   :  { %v1184_v18 = vadd.f32 %v1139_v11, %v1079_v22 }
 0x1fa   :  { %v1555_v63 = vpack.i.bf16 %v1185_v28, %v1184_v18  ;;  %v308_v28 = vand.u32 2147483647, %v2196_v9  ;;  %v2483_v18 = vld [vmem:[#allocation6_spill] sm:$0xff] }
 0x1fb   :  { %v1040_v1 = vpop.permute.xlu1 %1039 }
 0x1fc   :  { %1556 = vrot.lane.b32.xlu1 %v1555_v63, %s1653_s3  ;;  %v1082_v7 = vmul.f32 %v1040_v1, %v298_v33  ;;  %v307_v63 = vand.u32 2147483647, %v2483_v18  ;;  %v2484_v1 = vmov 0.0  }
 0x1fd   :  { %1470 = vmatprep.mubr.msk.f32.mxu1 %vm1656_vm2, %v2484_v1 }
 0x1ff   :  { %v1038_v61 = vpop.permute.xlu0 %1037  ;;  %v1145_v5 = vpop.permute.xlu1 %1144 }
 0x200   :  { %v1081_v40 = vmul.f32 %v1038_v61, %v297_v25  ;;  %v1187_v34 = vadd.f32 %v1145_v5, %v1082_v7 }
 0x203   :  { %v1143_v16 = vpop.permute.xlu0 %1142 }
 0x204   :  { %v1186_v23 = vadd.f32 %v1143_v16, %v1081_v40 }
 0x206   :  { %v1560_v52 = vpack.i.bf16 %v1187_v34, %v1186_v23 }
 0x207   :  { %v1042_v62 = vpop.permute.xlu0 %1041 }
 0x208   :  { %1561 = vrot.lane.b32.xlu0 %v1560_v52, %s1653_s3  ;;  %v1083_v19 = vmul.f32 %v1042_v62, %v299_v10 }
 0x20b   :  { %v1044_v27 = vpop.permute.xlu1 %1043  ;;  %v1147_v2 = vpop.permute.xlu0 %1146 }
 0x20c   :  { %v1084_v50 = vmul.f32 %v1044_v27, %v300_v43  ;;  %v1188_v48 = vadd.f32 %v1147_v2, %v1083_v19 }
 0x20f   :  { %v1149_v24 = vpop.permute.xlu1 %1148 }
 0x210   :  { %v1189_v56 = vadd.f32 %v1149_v24, %v1084_v50 }
 0x212   :  { %v1565_v12 = vpack.i.bf16 %v1189_v56, %v1188_v48 }
 0x213   :  { %v1046_v35 = vpop.permute.xlu0 %1045 }
 0x214   :  { %1566 = vrot.lane.b32.xlu1 %v1565_v12, %s1653_s3  ;;  %v1085_v38 = vmul.f32 %v1046_v35, %v301_v31 }
 0x217   :  { %v1048_v42 = vpop.permute.xlu1 %1047  ;;  %v1151_v3 = vpop.permute.xlu0 %1150 }
 0x218   :  { %v1086_v30 = vmul.f32 %v1048_v42, %v302_v15  ;;  %v1190_v57 = vadd.f32 %v1151_v3, %v1085_v38 }
 0x21b   :  { %v1153_v55 = vpop.permute.xlu1 %1152 }
 0x21c   :  { %v1191_v0 = vadd.f32 %v1153_v55, %v1086_v30 }
 0x21e   :  { %v1570_v26 = vpack.i.bf16 %v1191_v0, %v1190_v57 }
 0x21f   :  { %v1050_v29 = vpop.permute.xlu0 %1049 }
 0x220   :  { %1571 = vrot.lane.b32.xlu0 %v1570_v26, %s1653_s3  ;;  %v1087_v21 = vmul.f32 %v1050_v29, %v303_v53 }
 0x223   :  { %v1052_v49 = vpop.permute.xlu1 %1051  ;;  %v1155_v60 = vpop.permute.xlu0 %1154 }
 0x224   :  { %v1088_v51 = vmul.f32 %v1052_v49, %v304_v41  ;;  %v1192_v32 = vadd.f32 %v1155_v60, %v1087_v21  ;;  %v1657_v21 = vmov 1.0  }
 0x227   :  { %v1157_v36 = vpop.permute.xlu1 %1156 }
 0x228   :  { %v1193_v6 = vadd.f32 %v1157_v36, %v1088_v51  ;;  %v1199_v51 = vstv %s2478_s4 }
 0x22a   :  { %v1575_v59 = vpack.i.bf16 %v1193_v6, %v1192_v32 }
 0x22b   :  { %v1054_v46 = vpop.permute.xlu0 %1053 }
 0x22c   :  { %1576 = vrot.lane.b32.xlu1 %v1575_v59, %s1653_s3  ;;  %v1089_v58 = vmul.f32 %v1054_v46, %v305_v39 }
 0x22f   :  { %v1056_v13 = vpop.permute.xlu1 %1055  ;;  %v1159_v8 = vpop.permute.xlu0 %1158 }
 0x230   :  { %v1090_v45 = vmul.f32 %v1056_v13, %v306_v17  ;;  %v1194_v20 = vadd.f32 %v1159_v8, %v1089_v58 }
 0x233   :  { %v1161_v14 = vpop.permute.xlu1 %1160 }
 0x234   :  { %v1195_v4 = vadd.f32 %v1161_v14, %v1090_v45 }
 0x236   :  { %v1580_v54 = vpack.i.bf16 %v1195_v4, %v1194_v20 }
 0x237   :  { %v1058_v22 = vpop.permute.xlu0 %1057 }
 0x238   :  { %1581 = vrot.lane.b32.xlu0 %v1580_v54, %s1653_s3  ;;  %v1091_v47 = vmul.f32 %v1058_v22, %v307_v63 }
 0x23b   :  { %v1060_v11 = vpop.permute.xlu1 %1059  ;;  %v1163_v37 = vpop.permute.xlu0 %1162 }
 0x23c   :  { %v1092_v61 = vmul.f32 %v1060_v11, %v308_v28  ;;  %v1196_v25 = vadd.f32 %v1163_v37, %v1091_v47 }
 0x23f   :  { %v1165_v33 = vpop.permute.xlu1 %1164 }
 0x240   :  { %v1197_v5 = vadd.f32 %v1165_v33, %v1092_v61 }
 0x242   :  { %v1585_v7 = vpack.i.bf16 %v1197_v5, %v1196_v25 }
 0x244   :  { %1586 = vrot.lane.b32.xlu1 %v1585_v7, %s1653_s3 }
 0x262   :  { %v1552_v40 = vpop.permute.xlu0 %1551 }
 0x263   :  { %v1554_v16 = vunpack.i.h.bf16 %v1552_v40  ;;  %v1553_v34 = vunpack.i.l.bf16 %v1552_v40 }
 0x265   :  { %v1478_v23 = vpack.c.bf16 %v1554_v16, %v1553_v34 }
 0x267   :  { %1480 = vmatpush3.bf16.xpose.msk.msra.mxu1 %vm2431_vm4, %v1478_v23 }
 0x268   :  { %1481 = vmatprep.subr.bf16.mxu1 %v1655_v44 }
 0x26e   :  { %v1557_v52 = vpop.permute.xlu1 %1556 }
 0x26f   :  { %v1559_v62 = vunpack.i.h.bf16 %v1557_v52  ;;  %v1558_v27 = vunpack.i.l.bf16 %v1557_v52 }
 0x271   :  { %v1482_v10 = vpack.c.bf16 %v1559_v62, %v1558_v27 }
 0x273   :  { %1484 = vmatpush3.bf16.xpose.msk.msra.mxu1 %vm2431_vm4, %v1482_v10 }
 0x274   :  { %1485 = vmatprep.subr.bf16.mxu1 %v1655_v44 }
 0x27a   :  { %v1562_v43 = vpop.permute.xlu0 %1561 }
 0x27b   :  { %v1564_v2 = vunpack.i.h.bf16 %v1562_v43  ;;  %v1563_v19 = vunpack.i.l.bf16 %v1562_v43 }
 0x27d   :  { %v1486_v50 = vpack.c.bf16 %v1564_v2, %v1563_v19 }
 0x27f   :  { %1488 = vmatpush3.bf16.xpose.msk.msra.mxu1 %vm2431_vm4, %v1486_v50 }
 0x280   :  { %1489 = vmatprep.subr.bf16.mxu1 %v1655_v44 }
 0x286   :  { %v1567_v24 = vpop.permute.xlu1 %1566 }
 0x287   :  { %v1569_v48 = vunpack.i.h.bf16 %v1567_v24  ;;  %v1568_v56 = vunpack.i.l.bf16 %v1567_v24 }
 0x289   :  { %v1490_v12 = vpack.c.bf16 %v1569_v48, %v1568_v56 }
 0x28b   :  { %1492 = vmatpush3.bf16.xpose.msk.msra.mxu1 %vm2431_vm4, %v1490_v12 }
 0x28c   :  { %1493 = vmatprep.subr.bf16.mxu1 %v1655_v44 }
 0x292   :  { %v1572_v35 = vpop.permute.xlu0 %1571 }
 0x293   :  { %v1574_v42 = vunpack.i.h.bf16 %v1572_v35  ;;  %v1573_v31 = vunpack.i.l.bf16 %v1572_v35 }
 0x295   :  { %v1494_v15 = vpack.c.bf16 %v1574_v42, %v1573_v31 }
 0x297   :  { %1496 = vmatpush3.bf16.xpose.msk.msra.mxu1 %vm2431_vm4, %v1494_v15 }
 0x298   :  { %1497 = vmatprep.subr.bf16.mxu1 %v1655_v44 }
 0x29e   :  { %v1577_v3 = vpop.permute.xlu1 %1576 }
 0x29f   :  { %v1579_v38 = vunpack.i.h.bf16 %v1577_v3  ;;  %v1578_v30 = vunpack.i.l.bf16 %v1577_v3 }
 0x2a1   :  { %v1498_v55 = vpack.c.bf16 %v1579_v38, %v1578_v30 }
 0x2a3   :  { %1500 = vmatpush3.bf16.xpose.msk.msra.mxu1 %vm2431_vm4, %v1498_v55 }
 0x2a4   :  { %1501 = vmatprep.subr.bf16.mxu1 %v1655_v44 }
 0x2aa   :  { %v1582_v57 = vpop.permute.xlu0 %1581 }
 0x2ab   :  { %v1584_v0 = vunpack.i.h.bf16 %v1582_v57  ;;  %v1583_v26 = vunpack.i.l.bf16 %v1582_v57 }
 0x2ad   :  { %v1502_v29 = vpack.c.bf16 %v1584_v0, %v1583_v26 }
 0x2af   :  { %1504 = vmatpush3.bf16.xpose.msk.msra.mxu1 %vm2431_vm4, %v1502_v29 }
 0x2b0   :  { %1505 = vmatprep.subr.bf16.mxu1 %v1655_v44 }
 0x2b6   :  { %v1587_v49 = vpop.permute.xlu1 %1586 }
 0x2b7   :  { %v1589_v53 = vunpack.i.h.bf16 %v1587_v49  ;;  %v1588_v41 = vunpack.i.l.bf16 %v1587_v49 }
 0x2b9   :  { %v1506_v60 = vpack.c.bf16 %v1589_v53, %v1588_v41 }
 0x2bb   :  { %1508 = vmatpush3.bf16.xpose.msk.msra.mxu1 %vm2431_vm4, %v1506_v60 }
 0x2c2   :  { %1471 = vmatmul.mubr.msk.f32.vlgmr.msra.gmra.mrb[0].mxu1 %vm1248_vm3, %v1657_v21 }
 0x395   :  { %v1350_v36 = vpop.f32.mrb[0].mxu1 }
 0x396   :  { %v1351_v32 = vadd.f32 %v1350_v36, %v1199_v51  ;;  %v1472_v6 = vpop.f32.mrb[1].mxu1 }
 0x398   :  { %1354 = vst [vmem:[#allocation3] sm:$0x1] %v1351_v32 }
 0x399   :  { %1634 = shalt.err (!%p1631_p4)
}
 0x39a   :  { %s1635_s26 = scalar_lea.hbm %s2479_s5, 16 }
 0x39b   :  { %p1636_p5 = scmp.ne.s32.totalorder %s2479_s5, %s1635_s26  ;;  %p1639_p6 = scmp.lt.u32.totalorder %s1635_s26, %s2479_s5 }
 0x39d   :  { %p1641_p7 = pnand %p1639_p6, %p1636_p5 }
 0x39f   :  { %1644 = shalt.err (!%p1641_p7)
}
 0x3a0   :  { %1364 = dma.vmem_to_hbm [thread:$0]  %s1362_s21, 16, %s2479_s5, [#allocation4]  }
 0x3a1   :  { %1645 = dma.done.wait [#allocation4], 16  }
 0x3a2   :  { %1646 = vsyncadd [#allocation4], 4294967280 }
 0x3a3   :  { %1368 = vsyncpa [#allocation4], 1 }

</bundles_post_ra>
